<compile_context>
chip_gen: v6e
topology: v6e:2x2x1
jax: 0.10.0
libtpu: 0.0.40
codegen_flags: <defaults>
</compile_context>

<pallas_src>
import functools

import jax
import jax.numpy as jnp
from jax.experimental import pallas as pl
from jax.experimental.pallas import tpu as pltpu


_INV_SQRT2 = 0.7071067811865476


def _erf_approx(x):
    """Abramowitz & Stegun 7.1.26 rational erf approximation (|err| < 1.5e-7).

    Used because lax.erf (exact nn.GELU) has no Mosaic lowering; the error is far
    inside the test tolerance, so exact-GELU semantics are preserved.
    """
    p = 0.3275911
    a1, a2, a3, a4, a5 = (0.254829592, -0.284496736, 1.421413741,
                          -1.453152027, 1.061405429)
    s = jnp.where(x >= 0.0, 1.0, -1.0)
    ax = jnp.abs(x)
    t = 1.0 / (1.0 + p * ax)
    poly = ((((a5 * t + a4) * t + a3) * t + a2) * t + a1) * t
    return s * (1.0 - poly * jnp.exp(-ax * ax))


def _gelu_exact(x):
    # nn.GELU() default (erf form), not the tanh approximation.
    return 0.5 * x * (1.0 + _erf_approx(x * _INV_SQRT2))


def _excite(pooled, w1t_ref, w2_ref):
    """Tiny excitation MLP: (C, 1) pooled -> (C, 1) sigmoid gate.

    Written as broadcast-mul + lane/sublane reductions (VPU/XLU): no tiny-N MXU calls,
    no transposes, no 32-lane relayouts.
    """
    h = jnp.sum(w1t_ref[...].astype(jnp.float32) * pooled,
                axis=0, keepdims=True)                              # (1, Hd)
    h = _gelu_exact(h)
    g = jnp.sum(w2_ref[...].astype(jnp.float32) * h,
                axis=1, keepdims=True)                              # (C, 1)
    return 1.0 / (1.0 + jnp.exp(-g))                                # sigmoid


# ----------------------------------------------------------------------------- fused path


def se3d_fused_kernel(x_ref, w1t_ref, w2_ref, o_ref, *, inv_n):
    """One batch element per grid step: pool + MLP + rescale in one body.

    x_ref : (1, C, N)   whole spatial slab of this batch element (lanes = spatial)
    o_ref : (1, C, N)   out = x * gate (per-channel broadcast)
    """
    pooled = jnp.sum(x_ref[0].astype(jnp.float32), axis=-1, keepdims=True) * inv_n  # (C,1)
    gate = _excite(pooled, w1t_ref, w2_ref)                                         # (C,1) f32
    # Multiply in the storage dtype (bf16-native on v6e/v7x; exact for f32).
    o_ref[0] = (x_ref[0] * gate.astype(o_ref.dtype)).astype(o_ref.dtype)


# -------------------------------------------------------------------------- two-pass path


def se3d_pool_gate_kernel(x_ref, w1t_ref, w2_ref, y_ref, acc_ref, *,
                          inv_n, tile_n, n_total, mask_tail):
    """Per-(batch, spatial-tile) squeeze step; excitation MLP fused into the last tile.

    x_ref   : (1, C, TN)   spatial tile of this batch element
    y_ref   : (1, C, 1)    per-channel sigmoid gate (written on the last tile)
    acc_ref : (C, 1) f32   running spatial sum (VMEM scratch)
    """
    t = pl.program_id(1)

    @pl.when(t == 0)
    def _():
        acc_ref[...] = jnp.zeros_like(acc_ref)

    xf = x_ref[0].astype(jnp.float32)                               # (C, TN)
    if mask_tail:
        lane = jax.lax.broadcasted_iota(jnp.int32, xf.shape, 1)
        xf = jnp.where(t * tile_n + lane < n_total, xf, 0.0)
    acc_ref[...] += jnp.sum(xf, axis=-1, keepdims=True)

    @pl.when(t == pl.num_programs(1) - 1)
    def _():
        y_ref[0] = _excite(acc_ref[...] * inv_n, w1t_ref, w2_ref)


def se3d_scale_kernel(x_ref, y_ref, o_ref):
    """out tile = x tile * per-channel gate (broadcast over the lane/spatial axis)."""
    gate = y_ref[0]                                                 # (C, 1) f32
    o_ref[0] = (x_ref[0] * gate.astype(o_ref.dtype)).astype(o_ref.dtype)


# ------------------------------------------------------------------------------- wrapper


def _vmem_budget_bytes():
    """Usable VMEM budget: 75% of physical, conservative 64 MiB (v7x) fallback."""
    phys = 64 << 20
    try:
        cap = int(getattr(pltpu.get_tpu_info(), "vmem_capacity_bytes", 0))
        if cap > 0:
            phys = cap
    except Exception:
        pass
    return (phys * 3) // 4


def _pick_tile_n(n, c, dtype_bytes, budget_bytes):
    """Largest lane-dense (multiple-of-128) spatial tile whose 4 double-buffered
    x/out blocks (the scale pass) fit the VMEM budget."""
    per_lane = max(1, c * dtype_bytes)
    t = (max(budget_bytes, 1 << 20) // 4) // per_lane
    t = max(128, (t // 128) * 128)
    if n <= t:
        return n                     # whole axis in one block
    return t


def se3d(x, w1, w2, *, force_two_pass=False, tile_n=None):
    """SE3D forward. x: (B, C, D, H, W); w1: (Hd, C); w2: (C, Hd) (PyTorch layouts)."""
    B, C, D, H, W = x.shape
    N = D * H * W
    hidden = w1.shape[0]
    assert w1.shape == (hidden, C) and w2.shape == (C, hidden)

    x3 = x.reshape(B, C, N)                  # free view; spatial axis sits on lanes
    w1t = jnp.transpose(w1)                  # (C, hidden): tiny, stays resident
    dtype_bytes = x.dtype.itemsize
    budget = _vmem_budget_bytes()
    weights_bytes = 2 * (2 * C * hidden * 4)          # both weights, double-buffered

    slab_bytes = C * N * dtype_bytes
    fused_need = 4 * slab_bytes + weights_bytes + (2 << 20)   # 2 in + 2 out buffers

    if not force_two_pass and fused_need <= budget:
        # ---- single fused pass: x read once + written once (2x|x| HBM traffic) ----
        vmem_limit = int(min(max(fused_need + (4 << 20), 32 << 20), budget))
        out3 = pl.pallas_call(
            functools.partial(se3d_fused_kernel, inv_n=1.0 / N),
            out_shape=jax.ShapeDtypeStruct((B, C, N), x.dtype),
            grid_spec=pltpu.PrefetchScalarGridSpec(
                num_scalar_prefetch=0,
                grid=(B,),
                in_specs=[
                    pl.BlockSpec((1, C, N), lambda b: (b, 0, 0)),
                    pl.BlockSpec((C, hidden), lambda b: (0, 0)),
                    pl.BlockSpec((C, hidden), lambda b: (0, 0)),
                ],
                out_specs=pl.BlockSpec((1, C, N), lambda b: (b, 0, 0)),
            ),
            compiler_params=pltpu.CompilerParams(
                dimension_semantics=("parallel",),
                vmem_limit_bytes=vmem_limit),
        )(x3, w1t, w2)
        return out3.reshape(B, C, D, H, W)

    # ---- two-pass fallback: VMEM-budget-driven lane-dense tiles, masked tail ----
    if tile_n is None:
        tile_n = _pick_tile_n(N, C, dtype_bytes,
                              budget - weights_bytes - (4 << 20))
    n_t = pl.cdiv(N, tile_n)
    mask_tail = (N % tile_n) != 0
    block_bytes = C * tile_n * dtype_bytes
    vmem_limit = int(min(max(4 * block_bytes + weights_bytes + (4 << 20), 32 << 20),
                         budget))

    # Pass 1: global average pool (tiled reduction) + excitation MLP -> gate (B, C, 1).
    gate = pl.pallas_call(
        functools.partial(se3d_pool_gate_kernel, inv_n=1.0 / N, tile_n=tile_n,
                          n_total=N, mask_tail=mask_tail),
        out_shape=jax.ShapeDtypeStruct((B, C, 1), jnp.float32),
        grid_spec=pltpu.PrefetchScalarGridSpec(
            num_scalar_prefetch=0,
            grid=(B, n_t),
            in_specs=[
                pl.BlockSpec((1, C, tile_n), lambda b, t: (b, 0, t)),
                pl.BlockSpec((C, hidden), lambda b, t: (0, 0)),
                pl.BlockSpec((C, hidden), lambda b, t: (0, 0)),
            ],
            out_specs=pl.BlockSpec((1, C, 1), lambda b, t: (b, 0, 0)),
            scratch_shapes=[pltpu.VMEM((C, 1), jnp.float32)],
        ),
        compiler_params=pltpu.CompilerParams(
            dimension_semantics=("parallel", "arbitrary"),
            vmem_limit_bytes=vmem_limit),
    )(x3, w1t, w2)

    # Pass 2: per-channel rescale, fully parallel / pipelined over (B, spatial tiles).
    out3 = pl.pallas_call(
        se3d_scale_kernel,
        out_shape=jax.ShapeDtypeStruct((B, C, N), x.dtype),
        grid_spec=pltpu.PrefetchScalarGridSpec(
            num_scalar_prefetch=0,
            grid=(B, n_t),
            in_specs=[
                pl.BlockSpec((1, C, tile_n), lambda b, t: (b, 0, t)),
                pl.BlockSpec((1, C, 1), lambda b, t: (b, 0, 0)),
            ],
            out_specs=pl.BlockSpec((1, C, tile_n), lambda b, t: (b, 0, t)),
        ),
        compiler_params=pltpu.CompilerParams(
            dimension_semantics=("parallel", "parallel"),
            vmem_limit_bytes=vmem_limit),
    )(x3, gate)

    return out3.reshape(B, C, D, H, W)


def se3d_reference(x, w1, w2):
    """Pure-JAX reference matching the PyTorch SE3D forward."""
    B, C = x.shape[:2]
    pooled = jnp.mean(x.reshape(B, C, -1), axis=-1)                 # (B, C)
    h = jax.nn.gelu(pooled @ w1.T, approximate=False)               # exact-erf GELU
    y = jax.nn.sigmoid(h @ w2.T)                                    # (B, C)
    return x * y[:, :, None, None, None]


if __name__ == "__main__":
    # SE3D(in_c=32, out_c=32, expansion=0.25) -> hidden = int(32 * 0.25) = 8.
    B, in_c, out_c = 2, 32, 32
    expansion = 0.25
    hidden = int(in_c * expansion)
    C = out_c
    D, H, W = 4, 8, 8                      # N = 256 spatial positions

    key = jax.random.PRNGKey(0)
    kx, k1, k2 = jax.random.split(key, 3)
    x = jax.random.normal(kx, (B, C, D, H, W), dtype=jnp.float32)
    # PyTorch Linear weights (no bias): fc[0].weight (hidden, out_c), fc[2].weight (out_c, hidden).
    w1 = 0.5 * jax.random.normal(k1, (hidden, C), dtype=jnp.float32)
    w2 = 0.5 * jax.random.normal(k2, (C, hidden), dtype=jnp.float32)

    # Fused single-pass path (default whenever the per-batch slab fits VMEM).
    ref = se3d_reference(x, w1, w2)
    out = jax.block_until_ready(se3d(x, w1, w2))
    assert out.shape == x.shape
    assert jnp.allclose(out, ref, atol=1e-4, rtol=1e-4), "fused path mismatch"

    # Two-pass tiled fallback, exercising the cdiv grid + masked partial tail
    # (N = 300, tile_n = 128 -> 3 tiles, last tile has 44 valid lanes).
    D2, H2, W2 = 3, 10, 10
    x2 = jax.random.normal(kx, (B, C, D2, H2, W2), dtype=jnp.float32)
    ref2 = se3d_reference(x2, w1, w2)
    out2 = jax.block_until_ready(se3d(x2, w1, w2, force_two_pass=True, tile_n=128))
    assert out2.shape == x2.shape
    assert jnp.allclose(out2, ref2, atol=1e-4, rtol=1e-4), "two-pass path mismatch"

    # TODO(synk): inference-mode forward only; SE3D has no dropout/training-specific behavior.
    print("KERNEL_OK")
</pallas_src>

<mosaic_0001>
module attributes {stable_mosaic.version = 11 : i64} {
  func.func @se3d_fused_kernel(%arg0: i32, %arg1: memref<1x32x256xf32, #tpu.memory_space<vmem>>, %arg2: memref<32x8xf32, #tpu.memory_space<vmem>>, %arg3: memref<32x8xf32, #tpu.memory_space<vmem>>, %arg4: memref<1x32x256xf32, #tpu.memory_space<vmem>>) attributes {dimension_semantics = [#tpu.dimension_semantics<parallel>], iteration_bounds = array<i64: 2>, scalar_prefetch = 0 : i64, scratch_operands = 0 : i64, tpu.core_type = #tpu.core_type<tc>, window_params = [{transform_indices = @transform_0, window_bounds = array<i64: 1, 32, 256>}, {pipeline_mode = #tpu.pipeline_mode<synchronous>, transform_indices = @transform_1, window_bounds = array<i64: 32, 8>}, {pipeline_mode = #tpu.pipeline_mode<synchronous>, transform_indices = @transform_2, window_bounds = array<i64: 32, 8>}, {transform_indices = @transform_3, window_bounds = array<i64: 1, 32, 256>}]} {
    %c0 = arith.constant 0 : index
    %c0_0 = arith.constant 0 : index
    %c0_1 = arith.constant 0 : index
    %0 = vector.load %arg1[%c0, %c0_0, %c0_1] : memref<1x32x256xf32, #tpu.memory_space<vmem>>, vector<1x32x256xf32>
    %1 = vector.shape_cast %0 : vector<1x32x256xf32> to vector<32x256xf32>
    %cst = arith.constant dense<0.000000e+00> : vector<32xf32>
    %2 = vector.multi_reduction <add>, %1, %cst [1] : vector<32x256xf32> to vector<32xf32>
    %3 = vector.shape_cast %2 : vector<32xf32> to vector<32x1xf32>
    %cst_2 = arith.constant 3.906250e-03 : f32
    %4 = vector.broadcast %cst_2 : f32 to vector<32x1xf32>
    %5 = arith.mulf %3, %4 : vector<32x1xf32>
    %c0_3 = arith.constant 0 : index
    %c0_4 = arith.constant 0 : index
    %6 = vector.load %arg2[%c0_3, %c0_4] : memref<32x8xf32, #tpu.memory_space<vmem>>, vector<32x8xf32>
    %7 = vector.broadcast %5 : vector<32x1xf32> to vector<32x8xf32>
    %8 = arith.mulf %6, %7 : vector<32x8xf32>
    %cst_5 = arith.constant dense<0.000000e+00> : vector<8xf32>
    %9 = vector.multi_reduction <add>, %8, %cst_5 [0] : vector<32x8xf32> to vector<8xf32>
    %10 = vector.shape_cast %9 : vector<8xf32> to vector<1x8xf32>
    %cst_6 = arith.constant 5.000000e-01 : f32
    %11 = vector.broadcast %cst_6 : f32 to vector<1x8xf32>
    %12 = arith.mulf %11, %10 : vector<1x8xf32>
    %cst_7 = arith.constant 0.707106769 : f32
    %13 = vector.broadcast %cst_7 : f32 to vector<1x8xf32>
    %14 = arith.mulf %10, %13 : vector<1x8xf32>
    %cst_8 = arith.constant 0.000000e+00 : f32
    %15 = vector.broadcast %cst_8 : f32 to vector<1x8xf32>
    %16 = arith.cmpf oge, %14, %15 : vector<1x8xf32>
    %cst_9 = arith.constant 1.000000e+00 : f32
    %cst_10 = arith.constant -1.000000e+00 : f32
    %17 = vector.broadcast %cst_9 : f32 to vector<1x8xf32>
    %18 = vector.broadcast %cst_10 : f32 to vector<1x8xf32>
    %19 = arith.select %16, %17, %18 : vector<1x8xi1>, vector<1x8xf32>
    %20 = math.absf %14 : vector<1x8xf32>
    %cst_11 = arith.constant 0.327591091 : f32
    %21 = vector.broadcast %cst_11 : f32 to vector<1x8xf32>
    %22 = arith.mulf %21, %20 : vector<1x8xf32>
    %cst_12 = arith.constant 1.000000e+00 : f32
    %23 = vector.broadcast %cst_12 : f32 to vector<1x8xf32>
    %24 = arith.addf %23, %22 : vector<1x8xf32>
    %cst_13 = arith.constant 1.000000e+00 : f32
    %25 = vector.broadcast %cst_13 : f32 to vector<1x8xf32>
    %26 = arith.divf %25, %24 : vector<1x8xf32>
    %cst_14 = arith.constant 1.06140542 : f32
    %27 = vector.broadcast %cst_14 : f32 to vector<1x8xf32>
    %28 = arith.mulf %27, %26 : vector<1x8xf32>
    %cst_15 = arith.constant -1.45315206 : f32
    %29 = vector.broadcast %cst_15 : f32 to vector<1x8xf32>
    %30 = arith.addf %28, %29 : vector<1x8xf32>
    %31 = arith.mulf %30, %26 : vector<1x8xf32>
    %cst_16 = arith.constant 1.42141378 : f32
    %32 = vector.broadcast %cst_16 : f32 to vector<1x8xf32>
    %33 = arith.addf %31, %32 : vector<1x8xf32>
    %34 = arith.mulf %33, %26 : vector<1x8xf32>
    %cst_17 = arith.constant -0.284496725 : f32
    %35 = vector.broadcast %cst_17 : f32 to vector<1x8xf32>
    %36 = arith.addf %34, %35 : vector<1x8xf32>
    %37 = arith.mulf %36, %26 : vector<1x8xf32>
    %cst_18 = arith.constant 0.254829586 : f32
    %38 = vector.broadcast %cst_18 : f32 to vector<1x8xf32>
    %39 = arith.addf %37, %38 : vector<1x8xf32>
    %40 = arith.mulf %39, %26 : vector<1x8xf32>
    %cst_19 = arith.constant 0.000000e+00 : f32
    %41 = vector.broadcast %cst_19 : f32 to vector<1x8xf32>
    %42 = arith.subf %41, %20 : vector<1x8xf32>
    %43 = arith.mulf %42, %20 : vector<1x8xf32>
    %44 = math.exp %43 : vector<1x8xf32>
    %45 = arith.mulf %40, %44 : vector<1x8xf32>
    %cst_20 = arith.constant 1.000000e+00 : f32
    %46 = vector.broadcast %cst_20 : f32 to vector<1x8xf32>
    %47 = arith.subf %46, %45 : vector<1x8xf32>
    %48 = arith.mulf %19, %47 : vector<1x8xf32>
    %cst_21 = arith.constant 1.000000e+00 : f32
    %49 = vector.broadcast %cst_21 : f32 to vector<1x8xf32>
    %50 = arith.addf %49, %48 : vector<1x8xf32>
    %51 = arith.mulf %12, %50 : vector<1x8xf32>
    %c0_22 = arith.constant 0 : index
    %c0_23 = arith.constant 0 : index
    %52 = vector.load %arg3[%c0_22, %c0_23] : memref<32x8xf32, #tpu.memory_space<vmem>>, vector<32x8xf32>
    %53 = vector.broadcast %51 : vector<1x8xf32> to vector<32x8xf32>
    %54 = arith.mulf %52, %53 : vector<32x8xf32>
    %cst_24 = arith.constant dense<0.000000e+00> : vector<32xf32>
    %55 = vector.multi_reduction <add>, %54, %cst_24 [1] : vector<32x8xf32> to vector<32xf32>
    %56 = vector.shape_cast %55 : vector<32xf32> to vector<32x1xf32>
    %cst_25 = arith.constant 0.000000e+00 : f32
    %57 = vector.broadcast %cst_25 : f32 to vector<32x1xf32>
    %58 = arith.subf %57, %56 : vector<32x1xf32>
    %59 = math.exp %58 : vector<32x1xf32>
    %cst_26 = arith.constant 1.000000e+00 : f32
    %60 = vector.broadcast %cst_26 : f32 to vector<32x1xf32>
    %61 = arith.addf %60, %59 : vector<32x1xf32>
    %cst_27 = arith.constant 1.000000e+00 : f32
    %62 = vector.broadcast %cst_27 : f32 to vector<32x1xf32>
    %63 = arith.divf %62, %61 : vector<32x1xf32>
    %c0_28 = arith.constant 0 : index
    %c0_29 = arith.constant 0 : index
    %c0_30 = arith.constant 0 : index
    %64 = vector.load %arg1[%c0_28, %c0_29, %c0_30] : memref<1x32x256xf32, #tpu.memory_space<vmem>>, vector<1x32x256xf32>
    %65 = vector.shape_cast %64 : vector<1x32x256xf32> to vector<32x256xf32>
    %66 = vector.broadcast %63 : vector<32x1xf32> to vector<32x256xf32>
    %67 = arith.mulf %65, %66 : vector<32x256xf32>
    %c0_31 = arith.constant 0 : index
    %c0_32 = arith.constant 0 : index
    %c0_33 = arith.constant 0 : index
    %68 = vector.load %arg4[%c0_31, %c0_32, %c0_33] : memref<1x32x256xf32, #tpu.memory_space<vmem>>, vector<1x32x256xf32>
    %69 = vector.shape_cast %68 : vector<1x32x256xf32> to vector<32x256xf32>
    %70 = vector.shape_cast %67 : vector<32x256xf32> to vector<1x32x256xf32>
    tpu.vector_store %arg4[%c0_31, %c0_32, %c0_33], %70 {strides = array<i32>} : memref<1x32x256xf32, #tpu.memory_space<vmem>>, vector<1x32x256xf32>,
    return
  }
  func.func @transform_0(%arg0: i32) -> (i32, i32, i32) {
    %c0_i32 = arith.constant 0 : i32
    %c0_i32_0 = arith.constant 0 : i32
    %c0_i32_1 = arith.constant 0 : i32
    return %arg0, %c0_i32, %c0_i32_0 : i32, i32, i32
  }
  func.func @transform_1(%arg0: i32) -> (i32, i32) {
    %c0_i32 = arith.constant 0 : i32
    %c0_i32_0 = arith.constant 0 : i32
    %c0_i32_1 = arith.constant 0 : i32
    return %c0_i32, %c0_i32_0 : i32, i32
  }
  func.func @transform_2(%arg0: i32) -> (i32, i32) {
    %c0_i32 = arith.constant 0 : i32
    %c0_i32_0 = arith.constant 0 : i32
    %c0_i32_1 = arith.constant 0 : i32
    return %c0_i32, %c0_i32_0 : i32, i32
  }
  func.func @transform_3(%arg0: i32) -> (i32, i32, i32) {
    %c0_i32 = arith.constant 0 : i32
    %c0_i32_0 = arith.constant 0 : i32
    %c0_i32_1 = arith.constant 0 : i32
    return %arg0, %c0_i32, %c0_i32_0 : i32, i32, i32
  }
}

</mosaic_0001>

<bundles_post_ra>
// kernel: tpu_custom_call.1
= control target key start
LH: loop header
LB: loop body
LE: loop exit
PB: predicated region body
PF: predicated region fallthrough
CT: control target
= control target key end

     0   :  { %8 = vsyncpa [#allocation3], 0  ;;  %s839_s0 = inlined_call_operand.hbm [shape: f32[2,32,256], index: 0, kind: input, shape index: {}]   ;;  %s840_s1 = inlined_call_operand.vmem [shape: f32[32,8], index: 1, kind: input, shape index: {}]   ;;  %s841_s2 = inlined_call_operand.vmem [shape: f32[32,8], index: 2, kind: input, shape index: {}]   ;;  %s842_s3 = inlined_call_operand.hbm [shape: f32[2,32,256], index: 3, kind: output, shape index: {}]  }
   0x1   :  { %10 = vsyncpa [#allocation3 + $0x1], 0 }
   0x2   :  { %11 = vsyncpa [#allocation4], 0 }
   0x3   :  { %13 = vsyncpa [#allocation4 + $0x1], 0  ;;  %s617_s12 = smov 0   ;;  %s619_s13 = smov 0  }
   0x4   :  { %s621_s14 = smov 0   ;;  %s623_s15 = smov 0  }
   0x5 LB: > { %s638_s16 = sadd.s32 4294967295, %s588_s15   ;;  %s409_s17 = sadd.s32 4294967294, %s588_s15   ;;  %s588_s15 = sphi %s623_s15, %s857_s15   ;;  %s584_s14 = sphi %s621_s14, %s856_s14   ;;  %s580_s13 = sphi %s619_s13, %s855_s13   ;;  %s576_s12 = sphi %s617_s12, %s854_s12  }
   0x6   : > { %s642_s18 = sadd.s32 1, %s588_s15   ;;  %s26_s19 = sadd.s32 1, %s584_s14 }
   0x7   : > { %s23_s20 = ssub.s32 %s588_s15, %s642_s18  ;;  %p33_p0 = scmp.ne.s32.totalorder %s584_s14, %s580_s13 }
   0x8   : > { %p24_p1 = scmp.eq.s32.totalorder %s23_s20, 0  ;;  %p34_p2 = scmp.eq.s32.totalorder %s588_s15, 0 }
   0x9   : > { %p39_p3 = scmp.ne.s32.totalorder %s580_s13, %s576_s12  ;;  %p40_p4 = scmp.eq.s32.totalorder %s638_s16, 0 }
   0xa   : > { %s654_s21 = scalar_select %p24_p1, %s584_s14, %s26_s19  }
   0xb   : > { %p656_p5 = por %p34_p2, %p33_p0  ;;  %p660_p6 = por %p40_p4, %p39_p3 }
   0xc   : > { %p105_p7 = scmp.eq.s32.totalorder %s638_s16, 1  ;;  %p111_p8 = scmp.eq.s32.totalorder %s409_s17, 1 }
   0xd   : > { %s846_s23 = scalar_select %p660_p6, 1, 0 }
   0xe   : > { %p437_p10 = scmp.lt.s32.totalorder %s588_s15, 2  ;;  %p667_p11 = por %p105_p7, %p33_p0 }
   0xf   : > { %p671_p12 = por %p111_p8, %p39_p3  ;;  %s137_s26 = sand.u32 1, %s584_s14  }
  0x10   : > { %s847_s24 = scalar_select %p667_p11, 1, 0 }
  0x11   : > { %s848_s25 = scalar_select %p671_p12, 1, 0 }
  0x12   : > { %s423_s27 = sshll.u32 %s588_s15, 10  ;;  %s412_s28 = sshll.u32 %s137_s26, 6 }
  0x13   : > { %s680_s4 = scalar_lea.hbm %s839_s0, %s423_s27  ;;  %s141_s5 = scalar_lea.vmem [#allocation2], %s412_s28 }
  0x14   : > { %s148_s6 = sshll.u32 %s141_s5, 4  ;;  %p684_p13 = pnand %p437_p10, %p656_p5  ;;  %s688_s6 = int_to_ptr.vmem [resolvable:$true] %s148_s6 }
  0x15   : > { %s690_s8 = scalar_lea.sflag [#allocation3], %s137_s26  ;;  %s496_s9 = scalar_lea.hbm %s680_s4, 1024 }
  0x16   : > { %p497_p0 = scmp.ne.s32.totalorder %s680_s4, %s496_s9  ;;  %p498_p1 = pneg %p684_p13 }
  0x17   : > { %s501_s17 = scalar_lea.hbm %s839_s0, 2048  ;;  %p502_p4 = scmp.lt.s32.totalorder %s680_s4, %s839_s0 }
  0x18   : > { %p499_p2 = pnand %p498_p1, %p497_p0  ;;  %p503_p5 = scmp.lt.s32.totalorder %s501_s17, %s496_s9 }
  0x1a   : > { %p500_p3 = pneg %p499_p2  ;;  %p504_p7 = por %p503_p5, %p502_p4 }
  0x1c   : > { %p505_p8 = pnand %p504_p7, %p500_p3 }
  0x1e   : > { %508 = shalt.err (!%p505_p8)
}
  0x1f   : > { %s509_s22 = scalar_lea.vmem %s688_s6, 1024  ;;  %s590_s26 = smov [#allocation2]  }
  0x20   : > { %p510_p10 = scmp.ne.s32.totalorder %s688_s6, %s509_s22  ;;  %s514_s27 = sshll.u32 %s590_s26, 4  ;;  %s515_s27 = int_to_ptr.vmem [resolvable:$false] %s514_s27 }
  0x21   : > { %s516_s28 = scalar_lea.vmem %s515_s27, 2048  ;;  %p517_p2 = scmp.lt.s32.totalorder %s688_s6, %s515_s27 }
  0x22   : > { %p512_p9 = pnand %p510_p10, %p498_p1  ;;  %p518_p12 = scmp.lt.s32.totalorder %s516_s28, %s509_s22 }
  0x24   : > { %p513_p0 = pneg %p512_p9  ;;  %p519_p11 = por %p518_p12, %p517_p2 }
  0x26   : > { %p520_p6 = pnand %p519_p11, %p513_p0 }
  0x28   : > { %523 = shalt.err (!%p520_p6)
}
  0x29   : > { %s591_s29 = smov 256   ;;  %s592_s30 = smov 16  }
  0x2a   : > { %432 = dma.hbm_to_vmem [thread:$0]  (!%p684_p13), %s680_s4, 1024, %s688_s6, %s690_s8, %s591_s29, %s591_s29, %s592_s30  }
  0x2b   : > { %p415_p9 = scmp.ge.s32.totalorder %s588_s15, 1  ;;  %p156_p1 = scmp.lt.s32.totalorder %s588_s15, 3 }
  0x2d   : > { %p157_p3 = pnand %p415_p9, %p156_p1 }
  0x2e   : > { %s714_s5 = sand.u32 (!%p157_p3), 1, %s580_s13   ;;  %p850_p6 = scmp.ne.s32.totalorder (!%p157_p3), %s846_s23, 0 }
  0x2f   : > { %160 = sbr.rel (%p157_p3) target bundleno = 467 (0x1d3), region = 32  ;;  %s416_s9 = sshll.u32 (!%p157_p3), %s714_s5, 6 }
  0x30   : > { %s163_s10 = scalar_lea.sflag (!%p157_p3), [#allocation3], %s714_s5  ;;  %s166_s11 = scalar_lea.vmem (!%p157_p3), [#allocation2], %s416_s9 }
  0x34   : > { %567 = dma.done.wait (%p850_p6), %s163_s10, 1024  }
  0x35   : > { %569 = vsyncadd (%p850_p6), %s163_s10, 4294966272  ;;  %v724_v0 = vld [vmem:[%s166_s11] sm:$0xff]  ;;  %v726_v1 = vld [vmem:[%s166_s11 + $0x8] sm:$0xff]  ;;  %vm221_vm0 = vcmask 64512   ;;  %v593_v61 = vmov -1.0   ;;  %s424_s23 = sshll.u32 %s638_s16, 10 }
  0x36   : > { %v728_v2 = vld [vmem:[%s166_s11 + $0x20] sm:$0xff]  ;;  %v197_v3 = vadd.f32 %v726_v1, %v724_v0  ;;  %v732_v4 = vld [vmem:[%s166_s11 + $0x28] sm:$0xff]  ;;  %v734_v5 = vld [vmem:[%s166_s11 + $0x10] sm:$0xff]  ;;  %s188_s4 = scalar_lea.vmem [#allocation5], %s416_s9  ;;  %s792_s17 = scalar_lea.hbm %s842_s3, %s424_s23 }
  0x37   : > { %v736_v6 = vld [vmem:[%s166_s11 + $0x18] sm:$0xff]  ;;  %v203_v7 = vadd.f32 %v732_v4, %v728_v2  ;;  %v740_v8 = vld [vmem:[%s166_s11 + $0x30] sm:$0xff]  ;;  %v213_v15 = vld [vmem:[%s840_s1] sm:$0xff]  ;;  %s336_s6 = sshll.u32 %s188_s4, 4  ;;  %s323_s16 = scalar_lea.sflag [#allocation4], %s714_s5  ;;  %s794_s6 = int_to_ptr.vmem [resolvable:$true] %s336_s6 }
  0x38   : > { %v742_v9 = vld [vmem:[%s166_s11 + $0x38] sm:$0xff]  ;;  %198 = vadd.xlane.f32.xlu0 %v197_v3  ;;  %v200_v10 = vadd.f32 %v736_v6, %v734_v5  ;;  %v215_v17 = vld [vmem:[%s840_s1 + $0x10] sm:$0xff]  ;;  %v214_v18 = vld [vmem:[%s840_s1 + $0x8] sm:$0xff]  ;;  %s524_s9 = scalar_lea.vmem %s794_s6, 1024  ;;  %p851_p12 = scmp.ne.s32.totalorder %s847_s24, 0 }
  0x39   : > { %204 = vadd.xlane.f32.xlu1 %v203_v7  ;;  %v206_v11 = vadd.f32 %v742_v9, %v740_v8  ;;  %v216_v22 = vld [vmem:[%s840_s1 + $0x18] sm:$0xff]  ;;  %p525_p11 = scmp.ne.s32.totalorder %s794_s6, %s524_s9  ;;  %s594_s19 = smov [#allocation5]  }
  0x3a   : > { %s528_s20 = sshll.u32 %s594_s19, 4  ;;  %s529_s20 = int_to_ptr.vmem [resolvable:$false] %s528_s20 }
  0x3b   : > { %p526_p13 = pnand %p525_p11, %p851_p12  ;;  %s530_s22 = scalar_lea.vmem %s529_s20, 2048 }
  0x3c   : > { %201 = vadd.xlane.f32.xlu0 %v200_v10  ;;  %v263_v10 = vld [vmem:[%s841_s2 + $0x8] sm:$0xff]  ;;  %p531_p5 = scmp.lt.s32.totalorder %s794_s6, %s529_s20  ;;  %p532_p7 = scmp.lt.s32.totalorder %s530_s22, %s524_s9 }
  0x3d   : > { %207 = vadd.xlane.f32.xlu1 %v206_v11  ;;  %v262_v11 = vld [vmem:[%s841_s2] sm:$0xff]  ;;  %p527_p4 = pneg %p526_p13 }
  0x3e   : > { %p533_p8 = por %p532_p7, %p531_p5 }
  0x40   : > { %p534_p10 = pnand %p533_p8, %p527_p4 }
  0xc1   : > { %v199_v12 = vpop.xlane.xlu0 %198 }
  0xc2   : > { %v209_v13 = vmul.f32 0.00390625, %v199_v12  ;;  %v205_v14 = vpop.xlane.xlu1 %204 }
  0xc3   : > { %v211_v16 = vmul.f32 0.00390625, %v205_v14  ;;  %v264_v14 = vld [vmem:[%s841_s2 + $0x10] sm:$0xff] }
  0xc4   : > { %v217_v20 = vmul.f32 %v213_v15, %v209_v13  ;;  %v265_v13 = vld [vmem:[%s841_s2 + $0x18] sm:$0xff] }
  0xc5   : > { %v202_v19 = vpop.xlane.xlu0 %201  ;;  %v219_v25 = vmul.f32 %v215_v17, %v211_v16 }
  0xc6   : > { %v210_v21 = vmul.f32 0.00390625, %v202_v19  ;;  %v208_v23 = vpop.xlane.xlu1 %207  ;;  %v222_v28 = vsel %vm221_vm0, %v217_v20, 0.0 }
  0xc7   : > { %v212_v24 = vmul.f32 0.00390625, %v208_v23  ;;  %v225_v31 = vsel %vm221_vm0, %v219_v25, 0.0 }
  0xc8   : > { %v218_v26 = vmul.f32 %v214_v18, %v210_v21 }
  0xc9   : > { %v220_v27 = vmul.f32 %v216_v22, %v212_v24 }
  0xca   : > { %v223_v29 = vsel %vm221_vm0, %v218_v26, 0.0 }
  0xcb   : > { %v224_v30 = vadd.f32 %v223_v29, %v222_v28  ;;  %v227_v32 = vsel %vm221_vm0, %v220_v27, 0.0 }
  0xcd   : > { %v226_v33 = vadd.f32 %v225_v31, %v224_v30 }
  0xcf   : > { %v228_v34 = vadd.f32 %v227_v32, %v226_v33 }
  0xd1   : > { %v229_v35 = vrot.slane %v228_v34, 4 }
  0xd3   : > { %v230_v36 = vadd.f32 %v229_v35, %v228_v34 }
  0xd5   : > { %v231_v37 = vrot.slane %v230_v36, 2 }
  0xd7   : > { %v232_v38 = vadd.f32 %v231_v37, %v230_v36 }
  0xd9   : > { %v233_v39 = vrot.slane %v232_v38, 1 }
  0xdb   : > { %v234_v40 = vadd.f32 %v233_v39, %v232_v38 }
  0xdd   : > { %v236_v41 = vmul.f32 0.70710677, %v234_v40  ;;  %v235_v3 = vmul.f32 0.5, %v234_v40 }
  0xdf   : > { %v239_v42 = vand.u32 2147483647, %v236_v41  ;;  %vm237_vm1 = vcmp.ge.f32.partialorder %v236_v41, 0.0 }
  0xe0   : > { %v238_v62 = vsel %vm237_vm1, 1.0, %v593_v61 }
  0xe1   : > { %v240_v43 = vmul.f32 0.3275911, %v239_v42  ;;  %v253_v45 = vsub.f32 0.0, %v239_v42 }
  0xe3   : > { %v241_v44 = vadd.f32 1.0, %v240_v43  ;;  %v254_v46 = vmul.f32 %v253_v45, %v239_v42 }
  0xe5   : > { %476 = vrcp.f32 %v241_v44  ;;  %v255_v48 = vmul.f32 1.442695, %v254_v46 }
  0xe7   : > { %478 = vpow2.f32 %v255_v48 }
  0xf2   : > { %v477_v47 = vpop.eup %476 }
  0xf3   : > { %v244_v49 = vmul.f32 1.0614054, %v477_v47 }
  0xf4   : > { %v479_v58 = vpop.eup %478 }
  0xf5   : > { %v245_v50 = vadd.f32 -1.4531521, %v244_v49 }
  0xf7   : > { %v246_v51 = vmul.f32 %v477_v47, %v245_v50 }
  0xf9   : > { %v247_v52 = vadd.f32 1.4214138, %v246_v51 }
  0xfb   : > { %v248_v53 = vmul.f32 %v477_v47, %v247_v52 }
  0xfd   : > { %v249_v54 = vadd.f32 -0.28449672, %v248_v53 }
  0xff   : > { %v250_v55 = vmul.f32 %v477_v47, %v249_v54 }
 0x101   : > { %v251_v56 = vadd.f32 0.2548296, %v250_v55 }
 0x103   : > { %v252_v57 = vmul.f32 %v477_v47, %v251_v56 }
 0x105   : > { %v257_v59 = vmul.f32 %v479_v58, %v252_v57 }
 0x107   : > { %v258_v60 = vsub.f32 1.0, %v257_v59 }
 0x109   : > { %v259_v63 = vmul.f32 %v258_v60, %v238_v62 }
 0x10b   : > { %v260_v7 = vadd.f32 1.0, %v259_v63 }
 0x10d   : > { %v261_v12 = vmul.f32 %v260_v7, %v235_v3 }
 0x10f   : > { %v267_v15 = vmul.f32 %v263_v10, %v261_v12  ;;  %v266_v16 = vmul.f32 %v262_v11, %v261_v12  ;;  %v269_v19 = vmul.f32 %v265_v13, %v261_v12  ;;  %v268_v20 = vmul.f32 %v264_v14, %v261_v12 }
 0x111   : > { %v273_v17 = vsel %vm221_vm0, %v267_v15, 0.0  ;;  %v270_v18 = vsel %vm221_vm0, %v266_v16, 0.0  ;;  %v279_v21 = vsel %vm221_vm0, %v269_v19, 0.0  ;;  %v276_v22 = vsel %vm221_vm0, %v268_v20, 0.0 }
 0x112   : > { %274 = vadd.xlane.f32.xlu1 %v273_v17  ;;  %271 = vadd.xlane.f32.xlu0 %v270_v18 }
 0x116   : > { %280 = vadd.xlane.f32.xlu1 %v279_v21  ;;  %277 = vadd.xlane.f32.xlu0 %v276_v22 }
 0x19b   : > { %v275_v23 = vpop.xlane.xlu1 %274  ;;  %v272_v24 = vpop.xlane.xlu0 %271 }
 0x19c   : > { %v283_v25 = vsub.f32 0.0, %v275_v23  ;;  %v282_v26 = vsub.f32 0.0, %v272_v24 }
 0x19e   : > { %v288_v27 = vmul.f32 1.442695, %v283_v25  ;;  %v286_v28 = vmul.f32 1.442695, %v282_v26 }
 0x19f   : > { %v281_v29 = vpop.xlane.xlu1 %280  ;;  %v278_v30 = vpop.xlane.xlu0 %277 }
 0x1a0   : > { %480 = vpow2.f32 %v288_v27  ;;  %v285_v31 = vsub.f32 0.0, %v281_v29  ;;  %v284_v32 = vsub.f32 0.0, %v278_v30 }
 0x1a1   : > { %482 = vpow2.f32 %v286_v28 }
 0x1a2   : > { %v292_v33 = vmul.f32 1.442695, %v285_v31  ;;  %v290_v34 = vmul.f32 1.442695, %v284_v32 }
 0x1a4   : > { %484 = vpow2.f32 %v292_v33 }
 0x1a5   : > { %486 = vpow2.f32 %v290_v34 }
 0x1ad   : > { %v481_v35 = vpop.eup %480 }
 0x1ae   : > { %v483_v36 = vpop.eup %482  ;;  %v295_v37 = vadd.f32 1.0, %v481_v35 }
 0x1af   : > { %v294_v38 = vadd.f32 1.0, %v483_v36 }
 0x1b0   : > { %488 = vrcp.f32 %v295_v37 }
 0x1b1   : > { %v485_v39 = vpop.eup %484  ;;  %490 = vrcp.f32 %v294_v38 }
 0x1b2   : > { %v487_v40 = vpop.eup %486  ;;  %v297_v41 = vadd.f32 1.0, %v485_v39 }
 0x1b3   : > { %v296_v42 = vadd.f32 1.0, %v487_v40 }
 0x1b4   : > { %492 = vrcp.f32 %v297_v41 }
 0x1b5   : > { %494 = vrcp.f32 %v296_v42 }
 0x1bd   : > { %v489_v43 = vpop.eup %488 }
 0x1be   : > { %v491_v44 = vpop.eup %490  ;;  %v308_v45 = vmul.f32 %v489_v43, %v734_v5  ;;  %v309_v46 = vmul.f32 %v489_v43, %v736_v6 }
 0x1bf   : > { %v306_v47 = vmul.f32 %v491_v44, %v724_v0  ;;  %v307_v48 = vmul.f32 %v491_v44, %v726_v1 }
 0x1c0   : > { %316 = vst [vmem:[%s188_s4 + $0x10] sm:$0xff] %v308_v45  ;;  %317 = vst [vmem:[%s188_s4 + $0x18] sm:$0xff] %v309_v46 }
 0x1c1   : > { %v493_v49 = vpop.eup %492  ;;  %314 = vst [vmem:[%s188_s4] sm:$0xff] %v306_v47  ;;  %315 = vst [vmem:[%s188_s4 + $0x8] sm:$0xff] %v307_v48 }
 0x1c2   : > { %v495_v50 = vpop.eup %494  ;;  %v312_v5 = vmul.f32 %v493_v49, %v740_v8  ;;  %v313_v6 = vmul.f32 %v493_v49, %v742_v9 }
 0x1c3   : > { %v310_v0 = vmul.f32 %v495_v50, %v728_v2  ;;  %v311_v1 = vmul.f32 %v495_v50, %v732_v4 }
 0x1c4   : > { %320 = vst [vmem:[%s188_s4 + $0x30] sm:$0xff] %v312_v5  ;;  %321 = vst [vmem:[%s188_s4 + $0x38] sm:$0xff] %v313_v6 }
 0x1c5   : > { %318 = vst [vmem:[%s188_s4 + $0x20] sm:$0xff] %v310_v0  ;;  %319 = vst [vmem:[%s188_s4 + $0x28] sm:$0xff] %v311_v1 }
 0x1c6   : > { %537 = shalt.err (!%p534_p10)
}
 0x1c7   : > { %s538_s26 = scalar_lea.hbm %s792_s17, 1024  ;;  %s542_s29 = scalar_lea.hbm %s842_s3, 2048 }
 0x1c8   : > { %p539_p0 = scmp.ne.s32.totalorder %s792_s17, %s538_s26  ;;  %p543_p1 = scmp.lt.s32.totalorder %s792_s17, %s842_s3 }
 0x1c9   : > { %p544_p3 = scmp.lt.s32.totalorder %s542_s29, %s538_s26 }
 0x1ca   : > { %p540_p2 = pnand %p539_p0, %p851_p12 }
 0x1cb   : > { %p545_p6 = por %p544_p3, %p543_p1 }
 0x1cc   : > { %p541_p9 = pneg %p540_p2 }
 0x1ce   : > { %p546_p11 = pnand %p545_p6, %p541_p9 }
 0x1d0   : > { %549 = shalt.err (!%p546_p11)
}
 0x1d1   : > { %s595_s11 = smov 256   ;;  %s596_s23 = smov 16  }
 0x1d2   : > { %427 = dma.vmem_to_hbm [thread:$0]  (%p851_p12), %s794_s6, 1024, %s792_s17, %s323_s16, %s595_s11, %s595_s11, %s596_s23  }
 0x1d3 PF: > { %s351_s4 = sand.u32 1, %s576_s12   ;;  %p852_p13 = scmp.ne.s32.totalorder %s848_s25, 0 }
 0x1d4   : > { %p853_p4 = scmp.ge.s32.totalorder %s588_s15, 2  ;;  %s352_s7 = scalar_lea.sflag [#allocation4], %s351_s4 }
 0x1d6   : > { %p434_p5 = pnand %p853_p4, %p852_p13 }
 0x1d8   : > { %p435_p7 = pneg %p434_p5 }
 0x1da   : > { %571 = dma.done.wait (%p435_p7), %s352_s7, 1024  }
 0x1db   : > { %573 = vsyncadd (%p435_p7), %s352_s7, 4294966272  ;;  %p16_p8 = scmp.ge.s32.totalorder %s642_s18, 4   ;;  %s854_s12 = smov %s580_s13 }
 0x1dc   : > { %s855_s13 = smov %s584_s14  ;;  %s856_s14 = smov %s654_s21 }
 0x1dd   : > { %s857_s15 = smov %s642_s18  ;;  %18 = sbr.rel (!%p16_p8) target bundleno = 5 (0x5), region = 77 }
 0x1e2   :  { %357 = vsyncpa [#allocation3], 1 }
 0x1e3   :  { %359 = vsyncpa [#allocation3 + $0x1], 1 }
 0x1e4   :  { %360 = vsyncpa [#allocation4], 1 }
 0x1e5   :  { %362 = vsyncpa [#allocation4 + $0x1], 1 }

</bundles_post_ra>
